<compile_context>
chip_gen: v6e
topology: v6e:2x2x1
jax: 0.10.0
libtpu: 0.0.40
codegen_flags: <defaults>
</compile_context>

<pallas_src>
import jax
import jax.numpy as jnp
from jax.experimental import pallas as pl
from jax.experimental.pallas import tpu as pltpu


def _clga_kernel(xl_ref, xg_ref,
                 wl_ref, bl_ref,
                 wg_ref, bg_ref,
                 w1l_ref, w1g_ref, b1_ref,
                 w2_ref, b2_ref,
                 wfl_ref, wfg_ref, bf_ref,
                 o_ref):
    """Fused per-tile body. xl/xg: (1, C, T); o: (1, 2C, T)."""
    f32 = jnp.float32
    xl = xl_ref[0]                                     # (C, T), input dtype
    xg = xg_ref[0]                                     # (C, T)

    # Stage 1: three *independent* MXU matmuls (the gate's first conv was
    # folded through the projections in the wrapper), pipelining on the MXU.
    lp = (jnp.dot(wl_ref[...], xl, preferred_element_type=f32)
          + bl_ref[...].astype(f32))                   # (C, T) f32
    gp = (jnp.dot(wg_ref[...], xg, preferred_element_type=f32)
          + bg_ref[...].astype(f32))                   # (C, T) f32
    h = jnp.maximum(
        jnp.dot(w1l_ref[...], xl, preferred_element_type=f32)
        + jnp.dot(w1g_ref[...], xg, preferred_element_type=f32)
        + b1_ref[...].astype(f32),
        0.0)                                           # (C, T) f32

    # Downstream matmuls use the wrapper-chosen operand dtype (bf16 by default)
    # so the MXU runs at its bf16 rate; accumulation stays f32.
    mxu_dt = w2_ref.dtype

    # Stage 2: cross gate.
    gate = jax.nn.sigmoid(
        jnp.dot(w2_ref[...], h.astype(mxu_dt), preferred_element_type=f32)
        + b2_ref[...].astype(f32))                     # (C, T) f32

    gl = (lp * gate).astype(mxu_dt)                    # gated local
    gg = (gp * (1.0 - gate)).astype(mxu_dt)            # gated global

    # Stage 3: fusion Conv1x1(2C->2C) on concat([gl, gg]) == Wf_l@gl + Wf_g@gg.
    # TODO(synk): on v6e/v7x with 2C <= 256, stacking gl/gg into a (2C, T) VMEM
    # scratch and issuing one K=2C dot would fill the 256-wide MXU better.
    out = (jnp.dot(wfl_ref[...], gl, preferred_element_type=f32)
           + jnp.dot(wfg_ref[...], gg, preferred_element_type=f32)
           + bf_ref[...].astype(f32))                  # (2C, T) f32

    o_ref[0] = out.astype(o_ref.dtype)


def _vmem_capacity_bytes():
    """Per-core VMEM capacity; conservative (v7x = 64 MiB) if the query fails."""
    try:
        cap = int(pltpu.get_tpu_info().vmem_capacity_bytes)
        if cap > 0:
            return cap
    except Exception:
        pass
    return 64 * 1024 * 1024


def _pick_spatial_tile(hw_pad, batch, c, in_bytes, weight_bytes, vmem_budget):
    """Largest lane-dense (multiple-of-128) tile of the padded spatial axis that
    fits the VMEM budget (double-buffered IO + f32 intermediates + weights),
    capped at 2048 lanes, preferring >= 2 total grid steps so both v7x
    TensorCores get work under ("parallel", "parallel") sharding."""
    per_lane = 8 * c * in_bytes + 32 * c          # dbl-buffered in/out + f32 temps
    fixed = 2 * weight_bytes                      # weights are double-buffered too
    t_budget = max(128, (int(vmem_budget) - fixed) // max(per_lane, 1))
    cap = max(128, min(hw_pad, 2048, (t_budget // 128) * 128))
    cands = [t for t in range(128, cap + 1, 128) if hw_pad % t == 0]
    if not cands:
        return hw_pad
    stepped = [t for t in cands if batch * (hw_pad // t) >= 2]
    return max(stepped) if stepped else max(cands)


def cross_level_dual_gated_attention(local_feat, global_feat, params,
                                     *, mxu_dtype=jnp.bfloat16):
    """local_feat: (B, C, H, W); global_feat: (B, C, Hg, Wg); params: dict of
    2D conv weights (out, in) and 1D biases matching the PyTorch module.

    mxu_dtype is the operand dtype of the downstream (post-projection) matmuls;
    bf16 trades ~1e-3-level precision for the MXU's bf16 rate on all TPU
    generations. Pass mxu_dtype=None to keep them at f32.
    """
    B, C, H, W = local_feat.shape
    in_dtype = local_feat.dtype
    f32 = jnp.float32
    hi = jax.lax.Precision.HIGHEST

    if global_feat.shape[-2:] != (H, W):
        # A 1x1 conv (+bias) commutes exactly with bilinear resampling (the
        # interpolation weights sum to 1), so resize the raw global feature and
        # keep its projection fused in the kernel. antialias=False matches
        # F.interpolate(mode='bilinear', align_corners=False).
        gB, gC = global_feat.shape[:2]
        global_feat = jax.image.resize(global_feat, (gB, gC, H, W),
                                       method="bilinear", antialias=False)

    HW = H * W
    HW_pad = ((HW + 127) // 128) * 128            # keep output stores lane-dense
    xl = local_feat.reshape(B, C, HW)
    xg = global_feat.astype(in_dtype).reshape(B, C, HW)
    if HW_pad != HW:
        pad = ((0, 0), (0, 0), (0, HW_pad - HW))
        xl = jnp.pad(xl, pad)
        xg = jnp.pad(xg, pad)

    # --- Trace-time weight prep: split concat-consuming weights, fold the
    # gate's first conv through the projections, cast per stage. --------------
    wl = params["w_local"].astype(f32)                 # (C, C)
    wg = params["w_global"].astype(f32)                # (C, C)
    bl = params["b_local"].astype(f32)                 # (C,)
    bg = params["b_global"].astype(f32)                # (C,)
    w1 = params["w_gate1"].astype(f32)                 # (C, 2C)
    b1 = params["b_gate1"].astype(f32)                 # (C,)
    w1l, w1g = w1[:, :C], w1[:, C:]
    # relu(W1_l@(Wl@x+bl) + W1_g@(Wg@y+bg) + b1) == relu(W1l'@x + W1g'@y + b1')
    w1l_f = jnp.dot(w1l, wl, precision=hi)             # (C, C)
    w1g_f = jnp.dot(w1g, wg, precision=hi)             # (C, C)
    b1_f = (jnp.dot(w1l, bl, precision=hi)
            + jnp.dot(w1g, bg, precision=hi) + b1)     # (C,)

    mxu_dt = jnp.dtype(mxu_dtype) if mxu_dtype is not None else jnp.dtype(f32)
    w2 = params["w_gate2"].astype(mxu_dt)              # (C, C)
    b2 = params["b_gate2"].astype(f32)                 # (C,)
    wf = params["w_fusion"].astype(mxu_dt)             # (2C, 2C)
    wfl, wfg = wf[:, :C], wf[:, C:]
    bf = params["b_fusion"].astype(f32)                # (2C,)

    weights = (
        wl.astype(in_dtype), bl.reshape(C, 1),
        wg.astype(in_dtype), bg.reshape(C, 1),
        w1l_f.astype(in_dtype), w1g_f.astype(in_dtype), b1_f.reshape(C, 1),
        w2, b2.reshape(C, 1),
        wfl, wfg, bf.reshape(2 * C, 1),
    )

    # --- Tile size / VMEM limit derived from the actual buffer budget. -------
    in_bytes = jnp.dtype(in_dtype).itemsize
    weight_bytes = sum(int(a.size) * jnp.dtype(a.dtype).itemsize for a in weights)
    capacity = _vmem_capacity_bytes()
    T = _pick_spatial_tile(HW_pad, B, C, in_bytes, weight_bytes, capacity // 2)
    per_lane = 8 * C * in_bytes + 32 * C               # dbl-buffered IO + f32 temps
    est_bytes = per_lane * T + 2 * weight_bytes
    # TODO(synk): pipeline_mode=pl.Buffered(1) on the grid-invariant weight
    # specs would halve their VMEM footprint and free room for larger T at big C.
    vmem_limit = int(min(capacity * 3 // 4,
                         max(4 * est_bytes, 32 * 1024 * 1024)))

    grid = (B, HW_pad // T)

    def data_spec(c):
        return pl.BlockSpec((1, c, T), lambda b, s: (b, 0, s))

    def const_spec(shape):
        return pl.BlockSpec(shape, lambda b, s, _n=len(shape): (0,) * _n)

    cost = pl.CostEstimate(
        flops=int(18 * C * C * B * HW_pad),            # 5x C^2 + 2x 2C*C MACs per px
        transcendentals=int(B * C * HW_pad),           # sigmoid
        bytes_accessed=int(4 * B * C * HW_pad * in_bytes + weight_bytes),
    )

    out3 = pl.pallas_call(
        _clga_kernel,
        out_shape=jax.ShapeDtypeStruct((B, 2 * C, HW_pad), in_dtype),
        grid_spec=pltpu.PrefetchScalarGridSpec(
            num_scalar_prefetch=0,
            grid=grid,
            in_specs=[
                data_spec(C),                    # local feature  (1, C, T)
                data_spec(C),                    # global feature (1, C, T)
                const_spec((C, C)),              # w_local
                const_spec((C, 1)),              # b_local
                const_spec((C, C)),              # w_global
                const_spec((C, 1)),              # b_global
                const_spec((C, C)),              # folded gate1 (local half)
                const_spec((C, C)),              # folded gate1 (global half)
                const_spec((C, 1)),              # folded gate1 bias
                const_spec((C, C)),              # w_gate2
                const_spec((C, 1)),              # b_gate2
                const_spec((2 * C, C)),          # w_fusion (local half)
                const_spec((2 * C, C)),          # w_fusion (global half)
                const_spec((2 * C, 1)),          # b_fusion
            ],
            out_specs=pl.BlockSpec((1, 2 * C, T), lambda b, s: (b, 0, s)),
        ),
        compiler_params=pltpu.CompilerParams(
            dimension_semantics=("parallel", "parallel"),
            vmem_limit_bytes=vmem_limit,
        ),
        cost_estimate=cost,
    )(xl, xg, *weights)

    return out3[:, :, :HW].reshape(B, 2 * C, H, W)


def _reference(local_feat, global_feat, params, mxu_dtype=None):
    """Straight port of the PyTorch forward (optionally mirroring the kernel's
    bf16 operand casts on the downstream matmuls)."""
    hi = jax.lax.Precision.HIGHEST
    f32 = jnp.float32

    def conv1x1(x, w, b):
        return (jnp.einsum("bihw,oi->bohw", x, w, precision=hi,
                           preferred_element_type=f32)
                + b[None, :, None, None])

    B, C, H, W = local_feat.shape
    lp = conv1x1(local_feat, params["w_local"], params["b_local"])
    gp = conv1x1(global_feat, params["w_global"], params["b_global"])
    if gp.shape[-2:] != (H, W):
        gp = jax.image.resize(gp, (B, C, H, W), method="bilinear",
                              antialias=False)

    concat = jnp.concatenate([lp, gp], axis=1)
    h = jax.nn.relu(conv1x1(concat, params["w_gate1"], params["b_gate1"]))

    w2, wf = params["w_gate2"], params["w_fusion"]
    if mxu_dtype is not None:
        h, w2, wf = h.astype(mxu_dtype), w2.astype(mxu_dtype), wf.astype(mxu_dtype)
    gate = jax.nn.sigmoid(
        jnp.einsum("bihw,oi->bohw", h, w2, precision=hi,
                   preferred_element_type=f32)
        + params["b_gate2"][None, :, None, None])

    gl = lp * gate
    gg = gp * (1.0 - gate)
    if mxu_dtype is not None:
        gl, gg = gl.astype(mxu_dtype), gg.astype(mxu_dtype)
    fused = jnp.concatenate([gl, gg], axis=1)
    return (jnp.einsum("bihw,oi->bohw", fused, wf, precision=hi,
                       preferred_element_type=f32)
            + params["b_fusion"][None, :, None, None])


if __name__ == "__main__":
    key = jax.random.PRNGKey(0)
    keys = jax.random.split(key, 13)

    B, C, H, W = 2, 4, 16, 16
    local_feat = jax.random.normal(keys[0], (B, C, H, W), dtype=jnp.float32)
    global_feat = jax.random.normal(keys[1], (B, C, H, W), dtype=jnp.float32)
    global_small = jax.random.normal(keys[12], (B, C, H // 2, W // 2),
                                     dtype=jnp.float32)

    def winit(k, shape, fan_in):
        return jax.random.normal(k, shape, dtype=jnp.float32) / jnp.sqrt(float(fan_in))

    params = {
        "w_local": winit(keys[2], (C, C), C),
        "b_local": 0.1 * jax.random.normal(keys[3], (C,), dtype=jnp.float32),
        "w_global": winit(keys[4], (C, C), C),
        "b_global": 0.1 * jax.random.normal(keys[5], (C,), dtype=jnp.float32),
        "w_gate1": winit(keys[6], (C, 2 * C), 2 * C),
        "b_gate1": 0.1 * jax.random.normal(keys[7], (C,), dtype=jnp.float32),
        "w_gate2": winit(keys[8], (C, C), C),
        "b_gate2": 0.1 * jax.random.normal(keys[9], (C,), dtype=jnp.float32),
        "w_fusion": winit(keys[10], (2 * C, 2 * C), 2 * C),
        "b_fusion": 0.1 * jax.random.normal(keys[11], (2 * C,), dtype=jnp.float32),
    }

    # Case 1: matching spatial sizes.
    out = cross_level_dual_gated_attention(local_feat, global_feat, params)
    out = jax.block_until_ready(out)
    assert out.shape == (B, 2 * C, H, W)

    ref_bf16 = _reference(local_feat, global_feat, params, mxu_dtype=jnp.bfloat16)
    ref_f32 = _reference(local_feat, global_feat, params, mxu_dtype=None)
    err_bf16 = float(jnp.max(jnp.abs(out - ref_bf16)))
    err_f32 = float(jnp.max(jnp.abs(out - ref_f32)))
    assert jnp.allclose(out, ref_bf16, atol=1e-2, rtol=1e-2), (
        f"mismatch vs bf16-matmul reference (max abs err {err_bf16})")
    assert jnp.allclose(out, ref_f32, atol=6e-2, rtol=6e-2), (
        f"mismatch vs f32 reference (max abs err {err_f32})")

    # Case 2: low-resolution global feature (exercises the bilinear-resize path).
    out2 = cross_level_dual_gated_attention(local_feat, global_small, params)
    out2 = jax.block_until_ready(out2)
    assert out2.shape == (B, 2 * C, H, W)
    ref2 = _reference(local_feat, global_small, params, mxu_dtype=jnp.bfloat16)
    err2 = float(jnp.max(jnp.abs(out2 - ref2)))
    assert jnp.allclose(out2, ref2, atol=1e-2, rtol=1e-2), (
        f"resize path mismatch vs bf16-matmul reference (max abs err {err2})")

    print("KERNEL_OK")
</pallas_src>

<mosaic_0001>
module attributes {stable_mosaic.version = 11 : i64} {
  func.func @_clga_kernel(%arg0: i32, %arg1: i32, %arg2: memref<1x4x256xf32, #tpu.memory_space<vmem>>, %arg3: memref<1x4x256xf32, #tpu.memory_space<vmem>>, %arg4: memref<4x4xf32, #tpu.memory_space<vmem>>, %arg5: memref<4x1xf32, #tpu.memory_space<vmem>>, %arg6: memref<4x4xf32, #tpu.memory_space<vmem>>, %arg7: memref<4x1xf32, #tpu.memory_space<vmem>>, %arg8: memref<4x4xf32, #tpu.memory_space<vmem>>, %arg9: memref<4x4xf32, #tpu.memory_space<vmem>>, %arg10: memref<4x1xf32, #tpu.memory_space<vmem>>, %arg11: memref<4x4xbf16, #tpu.memory_space<vmem>>, %arg12: memref<4x1xf32, #tpu.memory_space<vmem>>, %arg13: memref<8x4xbf16, #tpu.memory_space<vmem>>, %arg14: memref<8x4xbf16, #tpu.memory_space<vmem>>, %arg15: memref<8x1xf32, #tpu.memory_space<vmem>>, %arg16: memref<1x8x256xf32, #tpu.memory_space<vmem>>) attributes {dimension_semantics = [#tpu.dimension_semantics<parallel>, #tpu.dimension_semantics<parallel>], iteration_bounds = array<i64: 2, 1>, scalar_prefetch = 0 : i64, scratch_operands = 0 : i64, tpu.core_type = #tpu.core_type<tc>, window_params = [{transform_indices = @transform_0, window_bounds = array<i64: 1, 4, 256>}, {transform_indices = @transform_1, window_bounds = array<i64: 1, 4, 256>}, {pipeline_mode = #tpu.pipeline_mode<synchronous>, transform_indices = @transform_2, window_bounds = array<i64: 4, 4>}, {pipeline_mode = #tpu.pipeline_mode<synchronous>, transform_indices = @transform_3, window_bounds = array<i64: 4, 1>}, {pipeline_mode = #tpu.pipeline_mode<synchronous>, transform_indices = @transform_4, window_bounds = array<i64: 4, 4>}, {pipeline_mode = #tpu.pipeline_mode<synchronous>, transform_indices = @transform_5, window_bounds = array<i64: 4, 1>}, {pipeline_mode = #tpu.pipeline_mode<synchronous>, transform_indices = @transform_6, window_bounds = array<i64: 4, 4>}, {pipeline_mode = #tpu.pipeline_mode<synchronous>, transform_indices = @transform_7, window_bounds = array<i64: 4, 4>}, {pipeline_mode = #tpu.pipeline_mode<synchronous>, transform_indices = @transform_8, window_bounds = array<i64: 4, 1>}, {pipeline_mode = #tpu.pipeline_mode<synchronous>, transform_indices = @transform_9, window_bounds = array<i64: 4, 4>}, {pipeline_mode = #tpu.pipeline_mode<synchronous>, transform_indices = @transform_10, window_bounds = array<i64: 4, 1>}, {pipeline_mode = #tpu.pipeline_mode<synchronous>, transform_indices = @transform_11, window_bounds = array<i64: 8, 4>}, {pipeline_mode = #tpu.pipeline_mode<synchronous>, transform_indices = @transform_12, window_bounds = array<i64: 8, 4>}, {pipeline_mode = #tpu.pipeline_mode<synchronous>, transform_indices = @transform_13, window_bounds = array<i64: 8, 1>}, {transform_indices = @transform_14, window_bounds = array<i64: 1, 8, 256>}]} {
    %c0 = arith.constant 0 : index
    %c0_0 = arith.constant 0 : index
    %c0_1 = arith.constant 0 : index
    %0 = vector.load %arg2[%c0, %c0_0, %c0_1] : memref<1x4x256xf32, #tpu.memory_space<vmem>>, vector<1x4x256xf32>
    %1 = vector.shape_cast %0 : vector<1x4x256xf32> to vector<4x256xf32>
    %c0_2 = arith.constant 0 : index
    %c0_3 = arith.constant 0 : index
    %c0_4 = arith.constant 0 : index
    %2 = vector.load %arg3[%c0_2, %c0_3, %c0_4] : memref<1x4x256xf32, #tpu.memory_space<vmem>>, vector<1x4x256xf32>
    %3 = vector.shape_cast %2 : vector<1x4x256xf32> to vector<4x256xf32>
    %c0_5 = arith.constant 0 : index
    %c0_6 = arith.constant 0 : index
    %4 = vector.load %arg4[%c0_5, %c0_6] : memref<4x4xf32, #tpu.memory_space<vmem>>, vector<4x4xf32>
    %cst = arith.constant dense<0.000000e+00> : vector<4x256xf32>
    %5 = tpu.matmul %4, %1, %cst {dimension_numbers = #tpu.dot_dimension_numbers<[1], [0], [0], [1], [0, 0, 1, 1], [], []>} : vector<4x4xf32>, vector<4x256xf32>, vector<4x256xf32> -> vector<4x256xf32>
    %c0_7 = arith.constant 0 : index
    %c0_8 = arith.constant 0 : index
    %6 = vector.load %arg5[%c0_7, %c0_8] : memref<4x1xf32, #tpu.memory_space<vmem>>, vector<4x1xf32>
    %7 = vector.broadcast %6 : vector<4x1xf32> to vector<4x256xf32>
    %8 = arith.addf %5, %7 : vector<4x256xf32>
    %c0_9 = arith.constant 0 : index
    %c0_10 = arith.constant 0 : index
    %9 = vector.load %arg6[%c0_9, %c0_10] : memref<4x4xf32, #tpu.memory_space<vmem>>, vector<4x4xf32>
    %cst_11 = arith.constant dense<0.000000e+00> : vector<4x256xf32>
    %10 = tpu.matmul %9, %3, %cst_11 {dimension_numbers = #tpu.dot_dimension_numbers<[1], [0], [0], [1], [0, 0, 1, 1], [], []>} : vector<4x4xf32>, vector<4x256xf32>, vector<4x256xf32> -> vector<4x256xf32>
    %c0_12 = arith.constant 0 : index
    %c0_13 = arith.constant 0 : index
    %11 = vector.load %arg7[%c0_12, %c0_13] : memref<4x1xf32, #tpu.memory_space<vmem>>, vector<4x1xf32>
    %12 = vector.broadcast %11 : vector<4x1xf32> to vector<4x256xf32>
    %13 = arith.addf %10, %12 : vector<4x256xf32>
    %c0_14 = arith.constant 0 : index
    %c0_15 = arith.constant 0 : index
    %14 = vector.load %arg8[%c0_14, %c0_15] : memref<4x4xf32, #tpu.memory_space<vmem>>, vector<4x4xf32>
    %cst_16 = arith.constant dense<0.000000e+00> : vector<4x256xf32>
    %15 = tpu.matmul %14, %1, %cst_16 {dimension_numbers = #tpu.dot_dimension_numbers<[1], [0], [0], [1], [0, 0, 1, 1], [], []>} : vector<4x4xf32>, vector<4x256xf32>, vector<4x256xf32> -> vector<4x256xf32>
    %c0_17 = arith.constant 0 : index
    %c0_18 = arith.constant 0 : index
    %16 = vector.load %arg9[%c0_17, %c0_18] : memref<4x4xf32, #tpu.memory_space<vmem>>, vector<4x4xf32>
    %cst_19 = arith.constant dense<0.000000e+00> : vector<4x256xf32>
    %17 = tpu.matmul %16, %3, %cst_19 {dimension_numbers = #tpu.dot_dimension_numbers<[1], [0], [0], [1], [0, 0, 1, 1], [], []>} : vector<4x4xf32>, vector<4x256xf32>, vector<4x256xf32> -> vector<4x256xf32>
    %18 = arith.addf %15, %17 : vector<4x256xf32>
    %c0_20 = arith.constant 0 : index
    %c0_21 = arith.constant 0 : index
    %19 = vector.load %arg10[%c0_20, %c0_21] : memref<4x1xf32, #tpu.memory_space<vmem>>, vector<4x1xf32>
    %20 = vector.broadcast %19 : vector<4x1xf32> to vector<4x256xf32>
    %21 = arith.addf %18, %20 : vector<4x256xf32>
    %cst_22 = arith.constant 0.000000e+00 : f32
    %22 = vector.broadcast %cst_22 : f32 to vector<4x256xf32>
    %23 = arith.maximumf %21, %22 : vector<4x256xf32>
    %c0_23 = arith.constant 0 : index
    %c0_24 = arith.constant 0 : index
    %24 = vector.load %arg11[%c0_23, %c0_24] : memref<4x4xbf16, #tpu.memory_space<vmem>>, vector<4x4xbf16>
    %25 = arith.truncf %23 : vector<4x256xf32> to vector<4x256xbf16>
    %cst_25 = arith.constant dense<0.000000e+00> : vector<4x256xf32>
    %26 = tpu.matmul %24, %25, %cst_25 {dimension_numbers = #tpu.dot_dimension_numbers<[1], [0], [0], [1], [0, 0, 1, 1], [], []>} : vector<4x4xbf16>, vector<4x256xbf16>, vector<4x256xf32> -> vector<4x256xf32>
    %c0_26 = arith.constant 0 : index
    %c0_27 = arith.constant 0 : index
    %27 = vector.load %arg12[%c0_26, %c0_27] : memref<4x1xf32, #tpu.memory_space<vmem>>, vector<4x1xf32>
    %28 = vector.broadcast %27 : vector<4x1xf32> to vector<4x256xf32>
    %29 = arith.addf %26, %28 : vector<4x256xf32>
    %30 = arith.negf %29 : vector<4x256xf32>
    %31 = math.exp %30 : vector<4x256xf32>
    %cst_28 = arith.constant 1.000000e+00 : f32
    %32 = vector.broadcast %cst_28 : f32 to vector<4x256xf32>
    %33 = arith.addf %32, %31 : vector<4x256xf32>
    %34 = arith.divf %32, %33 : vector<4x256xf32>
    %35 = arith.mulf %8, %34 : vector<4x256xf32>
    %36 = arith.truncf %35 : vector<4x256xf32> to vector<4x256xbf16>
    %cst_29 = arith.constant 1.000000e+00 : f32
    %37 = vector.broadcast %cst_29 : f32 to vector<4x256xf32>
    %38 = arith.subf %37, %34 : vector<4x256xf32>
    %39 = arith.mulf %13, %38 : vector<4x256xf32>
    %40 = arith.truncf %39 : vector<4x256xf32> to vector<4x256xbf16>
    %c0_30 = arith.constant 0 : index
    %c0_31 = arith.constant 0 : index
    %41 = vector.load %arg13[%c0_30, %c0_31] : memref<8x4xbf16, #tpu.memory_space<vmem>>, vector<8x4xbf16>
    %cst_32 = arith.constant dense<0.000000e+00> : vector<8x256xf32>
    %42 = tpu.matmul %41, %36, %cst_32 {dimension_numbers = #tpu.dot_dimension_numbers<[1], [0], [0], [1], [0, 0, 1, 1], [], []>} : vector<8x4xbf16>, vector<4x256xbf16>, vector<8x256xf32> -> vector<8x256xf32>
    %c0_33 = arith.constant 0 : index
    %c0_34 = arith.constant 0 : index
    %43 = vector.load %arg14[%c0_33, %c0_34] : memref<8x4xbf16, #tpu.memory_space<vmem>>, vector<8x4xbf16>
    %cst_35 = arith.constant dense<0.000000e+00> : vector<8x256xf32>
    %44 = tpu.matmul %43, %40, %cst_35 {dimension_numbers = #tpu.dot_dimension_numbers<[1], [0], [0], [1], [0, 0, 1, 1], [], []>} : vector<8x4xbf16>, vector<4x256xbf16>, vector<8x256xf32> -> vector<8x256xf32>
    %45 = arith.addf %42, %44 : vector<8x256xf32>
    %c0_36 = arith.constant 0 : index
    %c0_37 = arith.constant 0 : index
    %46 = vector.load %arg15[%c0_36, %c0_37] : memref<8x1xf32, #tpu.memory_space<vmem>>, vector<8x1xf32>
    %47 = vector.broadcast %46 : vector<8x1xf32> to vector<8x256xf32>
    %48 = arith.addf %45, %47 : vector<8x256xf32>
    %c0_38 = arith.constant 0 : index
    %c0_39 = arith.constant 0 : index
    %c0_40 = arith.constant 0 : index
    %49 = vector.load %arg16[%c0_38, %c0_39, %c0_40] : memref<1x8x256xf32, #tpu.memory_space<vmem>>, vector<1x8x256xf32>
    %50 = vector.shape_cast %49 : vector<1x8x256xf32> to vector<8x256xf32>
    %51 = vector.shape_cast %48 : vector<8x256xf32> to vector<1x8x256xf32>
    tpu.vector_store %arg16[%c0_38, %c0_39, %c0_40], %51 {strides = array<i32>} : memref<1x8x256xf32, #tpu.memory_space<vmem>>, vector<1x8x256xf32>,
    return
  }
  func.func @transform_0(%arg0: i32, %arg1: i32) -> (i32, i32, i32) {
    %c0_i32 = arith.constant 0 : i32
    %c0_i32_0 = arith.constant 0 : i32
    return %arg0, %c0_i32, %arg1 : i32, i32, i32
  }
  func.func @transform_1(%arg0: i32, %arg1: i32) -> (i32, i32, i32) {
    %c0_i32 = arith.constant 0 : i32
    %c0_i32_0 = arith.constant 0 : i32
    return %arg0, %c0_i32, %arg1 : i32, i32, i32
  }
  func.func @transform_2(%arg0: i32, %arg1: i32) -> (i32, i32) {
    %c0_i32 = arith.constant 0 : i32
    %c0_i32_0 = arith.constant 0 : i32
    %c0_i32_1 = arith.constant 0 : i32
    return %c0_i32, %c0_i32_0 : i32, i32
  }
  func.func @transform_3(%arg0: i32, %arg1: i32) -> (i32, i32) {
    %c0_i32 = arith.constant 0 : i32
    %c0_i32_0 = arith.constant 0 : i32
    %c0_i32_1 = arith.constant 0 : i32
    return %c0_i32, %c0_i32_0 : i32, i32
  }
  func.func @transform_4(%arg0: i32, %arg1: i32) -> (i32, i32) {
    %c0_i32 = arith.constant 0 : i32
    %c0_i32_0 = arith.constant 0 : i32
    %c0_i32_1 = arith.constant 0 : i32
    return %c0_i32, %c0_i32_0 : i32, i32
  }
  func.func @transform_5(%arg0: i32, %arg1: i32) -> (i32, i32) {
    %c0_i32 = arith.constant 0 : i32
    %c0_i32_0 = arith.constant 0 : i32
    %c0_i32_1 = arith.constant 0 : i32
    return %c0_i32, %c0_i32_0 : i32, i32
  }
  func.func @transform_6(%arg0: i32, %arg1: i32) -> (i32, i32) {
    %c0_i32 = arith.constant 0 : i32
    %c0_i32_0 = arith.constant 0 : i32
    %c0_i32_1 = arith.constant 0 : i32
    return %c0_i32, %c0_i32_0 : i32, i32
  }
  func.func @transform_7(%arg0: i32, %arg1: i32) -> (i32, i32) {
    %c0_i32 = arith.constant 0 : i32
    %c0_i32_0 = arith.constant 0 : i32
    %c0_i32_1 = arith.constant 0 : i32
    return %c0_i32, %c0_i32_0 : i32, i32
  }
  func.func @transform_8(%arg0: i32, %arg1: i32) -> (i32, i32) {
    %c0_i32 = arith.constant 0 : i32
    %c0_i32_0 = arith.constant 0 : i32
    %c0_i32_1 = arith.constant 0 : i32
    return %c0_i32, %c0_i32_0 : i32, i32
  }
  func.func @transform_9(%arg0: i32, %arg1: i32) -> (i32, i32) {
    %c0_i32 = arith.constant 0 : i32
    %c0_i32_0 = arith.constant 0 : i32
    %c0_i32_1 = arith.constant 0 : i32
    return %c0_i32, %c0_i32_0 : i32, i32
  }
  func.func @transform_10(%arg0: i32, %arg1: i32) -> (i32, i32) {
    %c0_i32 = arith.constant 0 : i32
    %c0_i32_0 = arith.constant 0 : i32
    %c0_i32_1 = arith.constant 0 : i32
    return %c0_i32, %c0_i32_0 : i32, i32
  }
  func.func @transform_11(%arg0: i32, %arg1: i32) -> (i32, i32) {
    %c0_i32 = arith.constant 0 : i32
    %c0_i32_0 = arith.constant 0 : i32
    %c0_i32_1 = arith.constant 0 : i32
    return %c0_i32, %c0_i32_0 : i32, i32
  }
  func.func @transform_12(%arg0: i32, %arg1: i32) -> (i32, i32) {
    %c0_i32 = arith.constant 0 : i32
    %c0_i32_0 = arith.constant 0 : i32
    %c0_i32_1 = arith.constant 0 : i32
    return %c0_i32, %c0_i32_0 : i32, i32
  }
  func.func @transform_13(%arg0: i32, %arg1: i32) -> (i32, i32) {
    %c0_i32 = arith.constant 0 : i32
    %c0_i32_0 = arith.constant 0 : i32
    %c0_i32_1 = arith.constant 0 : i32
    return %c0_i32, %c0_i32_0 : i32, i32
  }
  func.func @transform_14(%arg0: i32, %arg1: i32) -> (i32, i32, i32) {
    %c0_i32 = arith.constant 0 : i32
    %c0_i32_0 = arith.constant 0 : i32
    return %arg0, %c0_i32, %arg1 : i32, i32, i32
  }
}

</mosaic_0001>

<bundles_post_ra>
// kernel: tpu_custom_call.1
= control target key start
LH: loop header
LB: loop body
LE: loop exit
PB: predicated region body
PF: predicated region fallthrough
CT: control target
= control target key end

     0   :  { %s1610_s0 = inlined_call_operand.vmem [shape: f32[2,4,256], index: 0, kind: input, shape index: {}]   ;;  %s1611_s1 = inlined_call_operand.vmem [shape: f32[2,4,256], index: 1, kind: input, shape index: {}]   ;;  %s1612_s2 = inlined_call_operand.vmem [shape: f32[4,4], index: 2, kind: input, shape index: {}]   ;;  %s1613_s3 = inlined_call_operand.vmem [shape: f32[4,1], index: 3, kind: input, shape index: {}]   ;;  %s1614_s4 = inlined_call_operand.vmem [shape: f32[4,4], index: 4, kind: input, shape index: {}]   ;;  %s1615_s5 = inlined_call_operand.vmem [shape: f32[4,1], index: 5, kind: input, shape index: {}]   ;;  %s1616_s6 = inlined_call_operand.vmem [shape: f32[4,4], index: 6, kind: input, shape index: {}]   ;;  %s1617_s7 = inlined_call_operand.vmem [shape: f32[4,4], index: 7, kind: input, shape index: {}]   ;;  %s1618_s8 = inlined_call_operand.vmem [shape: f32[4,1], index: 8, kind: input, shape index: {}]   ;;  %s1619_s9 = inlined_call_operand.vmem [shape: bf16[4,4], index: 9, kind: input, shape index: {}]   ;;  %s1620_s10 = inlined_call_operand.vmem [shape: f32[4,1], index: 10, kind: input, shape index: {}]   ;;  %s1621_s11 = inlined_call_operand.vmem [shape: bf16[8,4], index: 11, kind: input, shape index: {}]   ;;  %s1622_s12 = inlined_call_operand.vmem [shape: bf16[8,4], index: 12, kind: input, shape index: {}]   ;;  %s1623_s13 = inlined_call_operand.vmem [shape: f32[8,1], index: 13, kind: input, shape index: {}]   ;;  %s1624_s14 = inlined_call_operand.hbm [shape: f32[2,8,256], index: 14, kind: output, shape index: {}]  }
   0x1   :  { %1629 = sst [smem:[#allocation10_spill]] %s1613_s3 }
   0x2   :  { %19 = vsyncpa [#allocation3], 0 }
   0x3   :  { %21 = vsyncpa [#allocation3 + $0x1], 0  ;;  %s1440_s29 = smov 0   ;;  %s1442_s30 = smov 0  }
   0x4   :  { %s1444_s15 = smov 0   ;;  %s1446_s16 = smov 0  }
   0x5   :  { %s1448_s17 = smov 0   ;;  %s1450_s18 = smov 0  }
   0x6 LB: > { %1630 = sst [smem:[#allocation5_spill]] %s1348_s15  ;;  %s1177_s19 = sadd.s32 4294967295, %s1360_s18   ;;  %s1360_s18 = sphi %s1450_s18, %s27_s18   ;;  %s1356_s17 = sphi %s1448_s17, %s1642_s17   ;;  %s1352_s16 = sphi %s1446_s16, %s1641_s16   ;;  %s1348_s15 = sphi %s1444_s15, %s1645_s15   ;;  %s1344_s30 = sphi %s1442_s30, %s1644_s30   ;;  %s1340_s29 = sphi %s1440_s29, %s1643_s29  }
   0x7   : > { %1631 = sst [smem:[#allocation6_spill]] %s1356_s17  ;;  %s1178_s20 = sadd.s32 4294967294, %s1360_s18  }
   0x8   : > { %s39_s21 = sadd.s32 1, %s1356_s17  ;;  %s356_s22 = sadd.s32 1, %s1348_s15 }
   0x9   : > { %p41_p0 = scmp.ge.s32.totalorder %s39_s21, 2  ;;  %p366_p1 = scmp.ne.s32.totalorder %s1348_s15, %s1344_s30 }
   0xa   : > { %p367_p2 = scmp.eq.s32.totalorder %s1177_s19, 1  ;;  %p372_p3 = scmp.ne.s32.totalorder %s1344_s30, %s1340_s29 }
   0xb   : > { %s1647_s21 = smov (%p41_p0, %s39_s21), 0  ;;  %p373_p5 = scmp.eq.s32.totalorder %s1178_s20, 1 }
   0xc   : > { %1632 = sst [smem:[#allocation7_spill]] %s1647_s21  ;;  %p1480_p4 = por %p367_p2, %p366_p1 }
   0xd   : > { %s351_s24 = ssub.s32 %s1356_s17, %s1647_s21  ;;  %p1181_p6 = scmp.ge.s32.totalorder %s1360_s18, 1 }
   0xe   : > { %p354_p7 = scmp.eq.s32.totalorder %s351_s24, 0  ;;  %p1487_p8 = por %p373_p5, %p372_p3 }
   0xf   : > { %p453_p9 = scmp.lt.s32.totalorder %s1360_s18, 3 }
  0x10   : > { %s1634_s25 = scalar_select %p1487_p8, 1, 0 }
  0x11   : > { %s1493_s26 = scalar_select %p354_p7, %s1348_s15, %s356_s22  }
  0x12   : > { %1635 = sst [smem:[#allocation8_spill]] %s1634_s25  ;;  %p454_p10 = pnand %p1181_p6, %p453_p9 }
  0x13   : > { %1636 = sst [smem:[#allocation9_spill]] %s1493_s26  ;;  %p513_p11 = scmp.lt.s32.totalorder (!%p454_p10), %s1352_s16, 1 }
  0x14   : > { %457 = sbr.rel (%p454_p10) target bundleno = 701 (0x2bd), region = 76  ;;  %s1637_s3 = sld [smem:[#allocation10_spill]] (!%p454_p10) }
  0x15   : > { %s509_s21 = sand.u32 (!%p454_p10), 1, %s1344_s30  }
  0x16   : > { %s1182_s25 = sshll.u32 (!%p454_p10), %s509_s21, 4 }
  0x19   : > { %v1362_v0 = vmov 0.0   ;;  %s514_s27 = scalar_select %p513_p11, %s1352_s16, 1  ;;  %v862_v2 = vld [vmem:[%s1618_s8] sm:$0xf]  ;;  %v1363_v3 = vmov 0   ;;  %vm549_vm0 = vcmask 1043456  }
  0x1a   : > { %618 = vmatprep.mubr.f32.mxu1 %v1362_v0  ;;  %781 = vmatprep.mubr.f32.mxu0 %v1362_v0  ;;  %v537_v1 = vld [vmem:[%s1637_s3] sm:$0xf]  ;;  %vm545_vm1 = vcmask 31744   ;;  %vm884_vm2 = vcmask 1041408  }
  0x1b   : > { %1273 = vset.pattern.permute.xlu1 %v1363_v3  ;;  %1272 = vset.pattern.permute.xlu0 %v1363_v3  ;;  %s1212_s22 = sshll.u32 %s514_s27, 3  ;;  %v626_v4 = vld [vmem:[%s1615_s5] sm:$0xf]  ;;  %s1067_s27 = scalar_lea.sflag [#allocation3], %s509_s21 }
  0x1c   : > { %540 = vperm.xlu1 %1273, %v537_v1   ;;  %865 = vperm.xlu0 %1272, %v862_v2   ;;  %s520_s26 = scalar_lea.vmem %s1610_s0, %s1212_s22  ;;  %s530_s28 = scalar_lea.vmem %s1611_s1, %s1212_s22  ;;  %v875_v5 = vld [vmem:[%s1620_s10] sm:$0xf] }
  0x1d   : > { %v534_v6 = vld [vmem:[%s520_s26] sm:$0xff]  ;;  %s1214_s26 = sshll.u32 %s1352_s16, 8  ;;  %s511_s22 = scalar_lea.vmem [#allocation2], %s1182_s25 }
  0x1e   : > { %v535_v7 = vld [vmem:[%s530_s28] sm:$0xff]  ;;  %v544_v8 = vcombine.high %v534_v6, %v534_v6  ;;  %s1083_s28 = sshll.u32 %s511_s22, 4  ;;  %s1570_s24 = scalar_lea.hbm %s1624_s14, %s1214_s26  ;;  %s1084_s28 = int_to_ptr.vmem [resolvable:$true] %s1083_s28 }
  0x1f   : > { %v633_v9 = vcombine.high %v535_v7, %v535_v7  ;;  %v536_v10 = vld [vmem:[%s1612_s2] sm:$0xf]  ;;  %s1284_s17 = scalar_lea.vmem %s1084_s28, 256  ;;  %s1364_s16 = smov [#allocation2]  }
  0x20   : > { %629 = vperm.xlu1 %1273, %v626_v4   ;;  %878 = vperm.xlu0 %1272, %v875_v5   ;;  %v713_v11 = vld [vmem:[%s1617_s7] sm:$0xf]  ;;  %p1285_p12 = scmp.ne.s32.totalorder %s1084_s28, %s1284_s17  ;;  %s1288_s3 = sshll.u32 %s1364_s16, 4  ;;  %s1289_s3 = int_to_ptr.vmem [resolvable:$false] %s1288_s3 }
  0x21   : > { %1187 = vmatprep.subr.msk.mxu1 %vm549_vm0, %v544_v8  ;;  %1193 = vmatprep.subr.msk.mxu0 %vm549_vm0, %v633_v9  ;;  %v1056_v12 = vld [vmem:[%s1623_s13] sm:$0xff]  ;;  %s1290_s15 = scalar_lea.vmem %s1289_s3, 512  ;;  %p1291_p1 = scmp.lt.s32.totalorder %s1084_s28, %s1289_s3 }
  0x22   : > { %1188 = vmatpush1.msk.msra.mxu1 %vm549_vm0, %v534_v6  ;;  %1194 = vmatpush1.msk.msra.mxu0 %vm549_vm0, %v535_v7  ;;  %v625_v13 = vld [vmem:[%s1614_s4] sm:$0xf]  ;;  %p1286_p13 = pnand %p1285_p12, %p1480_p4  ;;  %p1292_p2 = scmp.lt.s32.totalorder %s1290_s15, %s1284_s17 }
  0x23   : > { %1189 = vmatmul.mubr.msk.f32.vlgmr.msra.gmra.mxu1 %vm545_vm1, %v536_v10  ;;  %1190 = vmatprep.subr.msk.mxu1 %vm549_vm0, %v633_v9  ;;  %v712_v14 = vld [vmem:[%s1616_s6] sm:$0xf] }
  0x24   : > { %1191 = vmatpush1.msk.msra.mxu1 %vm549_vm0, %v535_v7  ;;  %705 = vmatprep.mubr.f32.mxu1 %v1362_v0  ;;  %v872_v33 = vld [vmem:[%s1619_s9] sm:$0x3]  ;;  %p1287_p0 = pneg %p1286_p13  ;;  %p1293_p3 = por %p1292_p2, %p1291_p1 }
  0x25   : > { %1195 = vmatmul.mubr.msk.f32.vlgmr.msra.gmra.mxu0 %vm545_vm1, %v713_v11  ;;  %1196 = vmatprep.subr.msk.mxu1 %vm549_vm0, %v544_v8  ;;  %v954_v2 = vld [vmem:[%s1621_s11] sm:$0xf] }
  0x26   : > { %1059 = vperm.xlu0 %1272, %v1056_v12   ;;  %923 = vmatprep.mubr.bf16.mxu0 %v1363_v3  ;;  %v955_v4 = vld [vmem:[%s1622_s12] sm:$0xf]  ;;  %p1294_p5 = pnand %p1293_p3, %p1287_p0 }
  0x27   : > { %1192 = vmatmul.mubr.msk.f32.vlgmr.msra.gmra.mxu1 %vm545_vm1, %v625_v13 }
  0x28   : > { %1197 = vmatpush1.msk.msra.mxu1 %vm549_vm0, %v534_v6  ;;  %855 = vmatprep.mubr.f32.mxu1 %v1362_v0 }
  0x2b   : > { %1198 = vmatmul.mubr.msk.f32.vlgmr.msra.gmra.mxu1 %vm545_vm1, %v712_v14 }
  0x2c   : > { %997 = vmatprep.mubr.bf16.mxu1 %v1363_v3 }
  0x97   : > { %v866_v21 = vpop.permute.xlu0 %865  ;;  %v541_v47 = vpop.permute.xlu1 %540 }
  0x9b   : > { %v879_v34 = vpop.permute.xlu0 %878  ;;  %v630_v48 = vpop.permute.xlu1 %629 }
  0xa1   : > { %v1060_v8 = vpop.permute.xlu0 %1059 }
  0xe3   : > { %v620_v15 = vpop.f32.mrf.mxu1 }
  0xe4   : > { %v621_v49 = vadd.f32 %v620_v15, %v541_v47 }
  0xe5   : > { %v622_v16 = vpop.f32.mrf.mxu1  ;;  %v783_v19 = vpop.f32.mrf.mxu0 }
  0xe6   : > { %v623_v51 = vadd.f32 %v622_v16, %v541_v47 }
  0xe7   : > { %v707_v17 = vpop.f32.mrf.mxu1  ;;  %v785_v23 = vpop.f32.mrf.mxu0 }
  0xe8   : > { %v708_v52 = vadd.f32 %v707_v17, %v630_v48 }
  0xe9   : > { %v709_v18 = vpop.f32.mrf.mxu1 }
  0xea   : > { %v710_v56 = vadd.f32 %v709_v18, %v630_v48 }
  0xeb   : > { %v857_v20 = vpop.f32.mrf.mxu1 }
  0xec   : > { %v858_v22 = vadd.f32 %v857_v20, %v783_v19 }
  0xed   : > { %v859_v24 = vpop.f32.mrf.mxu1 }
  0xee   : > { %v868_v25 = vadd.f32 %v866_v21, %v858_v22  ;;  %v860_v26 = vadd.f32 %v859_v24, %v785_v23 }
  0xf0   : > { %v870_v27 = vmax.f32 %v868_v25, 0.0  ;;  %v869_v28 = vadd.f32 %v866_v21, %v860_v26 }
  0xf2   : > { %v873_v29 = vpack.c.bf16 %v870_v27, %v870_v27  ;;  %v871_v30 = vmax.f32 %v869_v28, 0.0 }
  0xf4   : > { %v874_v31 = vpack.c.bf16 %v871_v30, %v871_v30  ;;  %v886_v32 = vsel %vm884_vm2, %v873_v29, 0 }
  0xf6   : > { %1199 = vmatprep.subr.msk.bf16.mxu0 %vm884_vm2, %v874_v31 }
  0xf7   : > { %906 = vmatpush1.bf16.msra.mxu0 %v886_v32 }
  0xfa   : > { %1200 = vmatmul.mubr.msk.bf16.vlgmr.msra.gmra.mxu0 %vm545_vm1, %v872_v33 }
  0xfb   : > { %1047 = vmatprep.mubr.bf16.mxu0 %v1363_v3 }
 0x1ba   : > { %v925_v35 = vpop.f32.mrf.mxu0 }
 0x1bb   : > { %v926_v36 = vadd.f32 %v925_v35, %v879_v34 }
 0x1bc   : > { %v927_v37 = vpop.f32.mrf.mxu0 }
 0x1bd   : > { %v1201_v38 = vmul.f32 -1.442695, %v926_v36  ;;  %v928_v39 = vadd.f32 %v927_v37, %v879_v34 }
 0x1be   : > { %v929_v40 = vpop.f32.mrf.mxu0 }
 0x1bf   : > { %1276 = vpow2.f32 %v1201_v38  ;;  %v1202_v41 = vmul.f32 -1.442695, %v928_v39 }
 0x1c0   : > { %v930_v42 = vpop.f32.mrf.mxu0 }
 0x1c1   : > { %1278 = vpow2.f32 %v1202_v41 }
 0x1cc   : > { %v1277_v43 = vpop.eup %1276 }
 0x1cd   : > { %v938_v44 = vadd.f32 1.0, %v1277_v43 }
 0x1ce   : > { %v1279_v45 = vpop.eup %1278 }
 0x1cf   : > { %1280 = vrcp.f32 %v938_v44  ;;  %v939_v46 = vadd.f32 1.0, %v1279_v45 }
 0x1d1   : > { %1282 = vrcp.f32 %v939_v46 }
 0x1dc   : > { %v1281_v50 = vpop.eup %1280 }
 0x1dd   : > { %v944_v53 = vmul.f32 %v1281_v50, %v621_v49  ;;  %v948_v54 = vsub.f32 1.0, %v1281_v50 }
 0x1de   : > { %v1283_v55 = vpop.eup %1282 }
 0x1df   : > { %v945_v57 = vmul.f32 %v1283_v55, %v623_v51  ;;  %v946_v58 = vpack.c.bf16 %v944_v53, %v944_v53  ;;  %v949_v59 = vsub.f32 1.0, %v1283_v55  ;;  %v950_v60 = vmul.f32 %v948_v54, %v708_v52 }
 0x1e1   : > { %v947_v61 = vpack.c.bf16 %v945_v57, %v945_v57  ;;  %v951_v62 = vmul.f32 %v949_v59, %v710_v56  ;;  %v952_v63 = vpack.c.bf16 %v950_v60, %v950_v60  ;;  %v1010_v0 = vsel %vm884_vm2, %v946_v58, 0 }
 0x1e3   : > { %1205 = vmatprep.subr.msk.bf16.mxu0 %vm884_vm2, %v947_v61  ;;  %v953_v1 = vpack.c.bf16 %v951_v62, %v951_v62  ;;  %v960_v3 = vsel %vm884_vm2, %v952_v63, 0 }
 0x1e4   : > { %1030 = vmatpush1.bf16.msra.mxu0 %v1010_v0 }
 0x1e5   : > { %1203 = vmatprep.subr.msk.bf16.mxu1 %vm884_vm2, %v953_v1 }
 0x1e6   : > { %980 = vmatpush1.bf16.msra.mxu1 %v960_v3 }
 0x1e7   : > { %1206 = vmatmul.mubr.msk.bf16.vlgmr.msra.gmra.mxu0 %vm545_vm1, %v954_v2 }
 0x1e9   : > { %1204 = vmatmul.mubr.msk.bf16.vlgmr.msra.gmra.mxu1 %vm545_vm1, %v955_v4 }
 0x2a7   : > { %v1049_v5 = vpop.f32.mrf.mxu0 }
 0x2a9   : > { %v999_v6 = vpop.f32.mrf.mxu1  ;;  %v1051_v7 = vpop.f32.mrf.mxu0 }
 0x2aa   : > { %v1050_v9 = vadd.f32 %v1049_v5, %v999_v6 }
 0x2ab   : > { %v1001_v10 = vpop.f32.mrf.mxu1  ;;  %v1053_v11 = vpop.f32.mrf.mxu0 }
 0x2ac   : > { %v1062_v12 = vadd.f32 %v1060_v8, %v1050_v9  ;;  %v1052_v13 = vadd.f32 %v1051_v7, %v1001_v10 }
 0x2ad   : > { %v1003_v14 = vpop.f32.mrf.mxu1  ;;  %v1054_v15 = vpop.f32.mrf.mxu0 }
 0x2ae   : > { %1064 = vst [vmem:[%s511_s22] sm:$0xff] %v1062_v12  ;;  %v1063_v16 = vadd.f32 %v1060_v8, %v1052_v13 }
 0x2af   : > { %v1004_v17 = vpop.f32.mrf.mxu1 }
 0x2b0   : > { %1065 = vst [vmem:[%s511_s22 + $0x8] sm:$0xff] %v1063_v16 }
 0x2b1   : > { %1297 = shalt.err (!%p1294_p5)
}
 0x2b2   : > { %s1298_s25 = scalar_lea.hbm %s1570_s24, 256  ;;  %s1302_s22 = scalar_lea.hbm %s1624_s14, 512 }
 0x2b3   : > { %p1299_p6 = scmp.ne.s32.totalorder %s1570_s24, %s1298_s25  ;;  %p1303_p10 = scmp.lt.s32.totalorder %s1570_s24, %s1624_s14 }
 0x2b4   : > { %p1304_p11 = scmp.lt.s32.totalorder %s1302_s22, %s1298_s25 }
 0x2b5   : > { %p1300_p7 = pnand %p1299_p6, %p1480_p4 }
 0x2b6   : > { %p1305_p12 = por %p1304_p11, %p1303_p10 }
 0x2b7   : > { %p1301_p9 = pneg %p1300_p7 }
 0x2b9   : > { %p1306_p13 = pnand %p1305_p12, %p1301_p9 }
 0x2bb   : > { %1309 = shalt.err (!%p1306_p13)
}
 0x2bc   : > { %1215 = dma.vmem_to_hbm [thread:$0]  (%p1480_p4), %s1084_s28, 256, %s1570_s24, %s1067_s27  }
 0x2bd PF: > { %p1221_p0 = scmp.ge.s32.totalorder %s1360_s18, 2  ;;  %s1095_s16 = sand.u32 1, %s1340_s29  }
 0x2be   : > { %s1096_s3 = scalar_lea.sflag [#allocation3], %s1095_s16 }
 0x2bf   : > { %p1218_p1 = pnand %p1221_p0, %p1487_p8 }
 0x2c1   : > { %p1219_p2 = pneg %p1218_p1 }
 0x2c3   : > { %1335 = dma.done.wait (%p1219_p2), %s1096_s3, 256  }
 0x2c4   : > { %1337 = vsyncadd (%p1219_p2), %s1096_s3, 4294967040  ;;  %s27_s18 = sadd.s32 1, %s1360_s18   ;;  %s1639_s15 = sld [smem:[#allocation5_spill]] }
 0x2c5   : > { %p24_p3 = scmp.ge.s32.totalorder %s27_s18, 4   ;;  %s1640_s23 = sld [smem:[#allocation9_spill]] }
 0x2c6   : > { %s1641_s16 = sld [smem:[#allocation6_spill]]  ;;  %s1643_s29 = smov %s1344_s30 }
 0x2c7   : > { %s1642_s17 = sld [smem:[#allocation7_spill]]  ;;  %26 = sbr.rel (!%p24_p3) target bundleno = 6 (0x6), region = 114 }
 0x2ca   : > { %s1644_s30 = smov %s1639_s15 }
 0x2cb   : > { %s1645_s15 = smov %s1640_s23 }
 0x2cc   :  { %1101 = vsyncpa [#allocation3], 1 }
 0x2cd   :  { %1103 = vsyncpa [#allocation3 + $0x1], 1 }

</bundles_post_ra>
